<compile_context>
chip_gen: v5e
topology: v5e:2x2
jax: 0.10.0
libtpu: 0.0.40
codegen_flags: <defaults>
</compile_context>

<pallas_src>
import functools
import math

import jax
import jax.numpy as jnp
from jax import lax
from jax.experimental import pallas as pl
from jax.experimental.pallas import tpu as pltpu


# ----------------------------- tiling helpers ------------------------------

def _pick_tile(dim, target, align):
    """Largest multiple of `align` <= `target` that divides `dim`; else full dim."""
    if dim <= target:
        return dim
    t = (target // align) * align
    while t >= align:
        if dim % t == 0:
            return t
        t -= align
    return dim


# ------------------------------ linear kernels ------------------------------

def _linear_resident_kernel(x_ref, w_ref, b_ref, o_ref):
    # W and bias are resident in VMEM across the whole grid (constant index_map).
    acc = jnp.dot(x_ref[...], w_ref[...], preferred_element_type=jnp.float32)
    o_ref[...] = (acc + b_ref[...]).astype(o_ref.dtype)


def _linear_tiled_kernel(x_ref, w_ref, b_ref, o_ref, acc_ref):
    @pl.when(pl.program_id(2) == 0)
    def _():
        acc_ref[...] = jnp.zeros_like(acc_ref)

    acc_ref[...] += jnp.dot(x_ref[...], w_ref[...],
                            preferred_element_type=jnp.float32)

    @pl.when(pl.program_id(2) == pl.num_programs(2) - 1)
    def _():
        o_ref[...] = (acc_ref[...] + b_ref[...]).astype(o_ref.dtype)


def linear(x, w, b, *, out_dtype=None, tm=512, tn=512, tk=1024):
    """y = x @ w + b.  Weight-resident when it fits VMEM, else tiled K-reduction."""
    M, K = x.shape
    Kw, N = w.shape
    assert K == Kw and b.shape == (N,)
    out_dtype = out_dtype if out_dtype is not None else x.dtype
    b2 = b.reshape(1, N).astype(jnp.float32)

    itemsize = jnp.dtype(x.dtype).itemsize
    out_itemsize = jnp.dtype(out_dtype).itemsize
    w_bytes = K * N * jnp.dtype(w.dtype).itemsize

    # Row tiling (sublane axis): bf16 needs 16-aligned tiles.  If no aligned
    # divisor exists, pad M so pipelining survives awkward B*S values.
    tm_sel = _pick_tile(M, tm, 16)
    Mp = M
    x_in = x
    if tm_sel == M and M > tm:          # no aligned divisor found -> pad rows
        tm_sel = tm
        Mp = pl.cdiv(M, tm_sel) * tm_sel
        x_in = jnp.pad(x, ((0, Mp - M), (0, 0)))

    cost = pl.CostEstimate(
        flops=2 * Mp * K * N,
        transcendentals=0,
        bytes_accessed=(Mp * K + K * N) * itemsize + Mp * N * out_itemsize + N * 4)

    # Weight-resident path: W/bias DMA'd from HBM exactly once, grid only over M.
    resident_bytes = (2 * w_bytes + 2 * N * 4
                      + 2 * tm_sel * K * itemsize        # double-buffered x tiles
                      + 2 * tm_sel * N * out_itemsize)   # double-buffered out tiles
    if resident_bytes <= 24 * 1024 * 1024:
        vlim = min(56 << 20, max(2 * resident_bytes, 32 << 20))
        out = pl.pallas_call(
            _linear_resident_kernel,
            out_shape=jax.ShapeDtypeStruct((Mp, N), out_dtype),
            grid=(Mp // tm_sel,),
            in_specs=[
                pl.BlockSpec((tm_sel, K), lambda i: (i, 0)),
                pl.BlockSpec((K, N), lambda i: (0, 0)),      # resident weight
                pl.BlockSpec((1, N), lambda i: (0, 0)),      # resident bias
            ],
            out_specs=pl.BlockSpec((tm_sel, N), lambda i: (i, 0)),
            compiler_params=pltpu.CompilerParams(
                dimension_semantics=("parallel",),
                vmem_limit_bytes=vlim),
            cost_estimate=cost,
        )(x_in, w, b2)
    else:
        tn_sel = _pick_tile(N, tn, 128)
        tk_sel = _pick_tile(K, tk, 128)
        tile_bytes = (2 * tm_sel * tk_sel * itemsize
                      + 2 * tk_sel * tn_sel * itemsize
                      + 2 * tm_sel * tn_sel * out_itemsize
                      + tm_sel * tn_sel * 4 + 2 * tn_sel * 4)
        vlim = min(56 << 20, max(2 * tile_bytes, 32 << 20))
        out = pl.pallas_call(
            _linear_tiled_kernel,
            out_shape=jax.ShapeDtypeStruct((Mp, N), out_dtype),
            grid=(Mp // tm_sel, N // tn_sel, K // tk_sel),
            in_specs=[
                pl.BlockSpec((tm_sel, tk_sel), lambda i, j, k: (i, k)),
                pl.BlockSpec((tk_sel, tn_sel), lambda i, j, k: (k, j)),
                pl.BlockSpec((1, tn_sel), lambda i, j, k: (0, j)),
            ],
            out_specs=pl.BlockSpec((tm_sel, tn_sel), lambda i, j, k: (i, j)),
            scratch_shapes=[pltpu.VMEM((tm_sel, tn_sel), jnp.float32)],
            compiler_params=pltpu.CompilerParams(
                dimension_semantics=("parallel", "parallel", "arbitrary"),
                vmem_limit_bytes=vlim),
            cost_estimate=cost,
        )(x_in, w, b2)

    return out[:M] if Mp != M else out


# --------------------------- flash attention kernel --------------------------

def _flash_attn_kernel(q_ref, k_ref, v_ref, mask_ref, o_ref,
                       m_sc, l_sc, acc_sc, *, heads_per_group, head_dim):
    # q_ref/o_ref: (1, tq, G*Dh); k_ref/v_ref: (1, tkv, G*Dh); mask: (1, 1, tkv)
    G, Dh = heads_per_group, head_dim
    ki = pl.program_id(3)

    @pl.when(ki == 0)
    def _():
        m_sc[...] = jnp.full_like(m_sc, -1e30)   # finite: mask must be finite too
        l_sc[...] = jnp.zeros_like(l_sc)
        acc_sc[...] = jnp.zeros_like(acc_sc)

    mask = mask_ref[0].astype(jnp.float32)       # (1, tkv) additive key mask

    for h in range(G):                           # static unroll over grouped heads
        lo, hi = h * Dh, (h + 1) * Dh
        qh = q_ref[0, :, lo:hi]                  # (tq, Dh) bf16, scale pre-folded
        kh = k_ref[0, :, lo:hi]                  # (tkv, Dh)
        vh = v_ref[0, :, lo:hi]                  # (tkv, Dh)

        # QK^T: contract last dims directly (transpose absorbed into MXU feed).
        s = lax.dot_general(qh, kh, (((1,), (1,)), ((), ())),
                            preferred_element_type=jnp.float32)   # (tq, tkv)
        s = s + mask

        m_prev = m_sc[h]                                          # (tq, 1)
        m_new = jnp.maximum(m_prev, jnp.max(s, axis=-1, keepdims=True))
        alpha = jnp.exp(m_prev - m_new)
        p = jnp.exp(s - m_new)

        l_sc[h] = alpha * l_sc[h] + jnp.sum(p, axis=-1, keepdims=True)
        acc_sc[h] = alpha * acc_sc[h] + jnp.dot(
            p.astype(vh.dtype), vh, preferred_element_type=jnp.float32)
        m_sc[h] = m_new

    @pl.when(ki == pl.num_programs(3) - 1)
    def _():
        outs = []
        for h in range(G):
            inv = pl.reciprocal(l_sc[h], approx=True)             # EUP vrcp
            outs.append(acc_sc[h] * inv)                          # (tq, Dh)
        out = outs[0] if G == 1 else jnp.concatenate(outs, axis=-1)
        o_ref[0] = out.astype(o_ref.dtype)                        # lane-dense store


def flash_attention(qkv, mask, *, hidden, num_heads, tq=512, tkv=512):
    """qkv: [B, S, 3H] (fused Q|K|V, head-major within each); mask: [B,1,S] additive.

    Returns context in [B, S, H] layout (heads merged along the last dim),
    ready for the output projection without any transpose.
    """
    B, S, H3 = qkv.shape
    H, nH = hidden, num_heads
    Dh = H // nH
    assert H3 == 3 * H and nH * Dh == H

    # Head-group size G: make the per-block last dim (G*Dh) a 128-lane multiple
    # so the output store is lane-dense and PV matmul N >= 128.
    if Dh % 128 == 0:
        G = 1
    elif (128 % Dh == 0) and (nH % (128 // Dh) == 0):
        G = 128 // Dh
    else:
        G = None                                   # no 128-aligned group exists

    tq = _pick_tile(S, tq, 16)                     # bf16 sublane tile
    tkv = _pick_tile(S, tkv, 128)                  # lane dim of the mask block

    if G is not None:
        # Fast path: read q/k/v straight out of the fused qkv activation via
        # column-block index_maps (no slice/transpose copies at all).
        GDh = G * Dh
        nG = H // GDh                              # head-group grid extent
        operands = (qkv, qkv, qkv, mask)
        q_spec = pl.BlockSpec((1, tq, GDh), lambda b, g, qi, ki: (b, qi, g))
        k_spec = pl.BlockSpec((1, tkv, GDh), lambda b, g, qi, ki: (b, ki, nG + g))
        v_spec = pl.BlockSpec((1, tkv, GDh), lambda b, g, qi, ki: (b, ki, 2 * nG + g))
    else:
        # TODO(synk): fallback (toy hidden sizes) copies q/k/v out of the fused
        # qkv; the fast path above is the copy-free one used at real sizes.
        G, GDh, nG = nH, H, 1
        q = qkv[:, :, :H]
        k = qkv[:, :, H:2 * H]
        v = qkv[:, :, 2 * H:]
        operands = (q, k, v, mask)
        q_spec = pl.BlockSpec((1, tq, GDh), lambda b, g, qi, ki: (b, qi, 0))
        k_spec = pl.BlockSpec((1, tkv, GDh), lambda b, g, qi, ki: (b, ki, 0))
        v_spec = pl.BlockSpec((1, tkv, GDh), lambda b, g, qi, ki: (b, ki, 0))

    mask_spec = pl.BlockSpec((1, 1, tkv), lambda b, g, qi, ki: (b, 0, ki))
    out_spec = pl.BlockSpec((1, tq, GDh), lambda b, g, qi, ki: (b, qi, g))

    cost = pl.CostEstimate(
        flops=4 * B * nH * S * S * Dh,             # QK^T + PV
        transcendentals=B * nH * S * S,            # exp
        bytes_accessed=4 * B * S * H * jnp.dtype(qkv.dtype).itemsize + B * S * 4)

    kernel = functools.partial(_flash_attn_kernel,
                               heads_per_group=G, head_dim=Dh)
    return pl.pallas_call(
        kernel,
        out_shape=jax.ShapeDtypeStruct((B, S, H), qkv.dtype),
        grid=(B, nG, S // tq, S // tkv),           # kv reduction axis last
        in_specs=[q_spec, k_spec, v_spec, mask_spec],
        out_specs=out_spec,
        scratch_shapes=[
            pltpu.VMEM((G, tq, 1), jnp.float32),   # running max (per head)
            pltpu.VMEM((G, tq, 1), jnp.float32),   # running sum
            pltpu.VMEM((G, tq, Dh), jnp.float32),  # accumulator
        ],
        compiler_params=pltpu.CompilerParams(
            dimension_semantics=("parallel", "parallel", "parallel", "arbitrary")),
        cost_estimate=cost,
    )(*operands)


# ------------------------------ module wrapper -------------------------------

def init_params(key, hidden_size):
    """Deterministic synthetic parameter init (matches nn.Linear shapes), f32."""
    ks = jax.random.split(key, 8)
    s = 1.0 / math.sqrt(hidden_size)

    def lin(kw, kb):
        w = jax.random.uniform(kw, (hidden_size, hidden_size), jnp.float32, -s, s)
        b = jax.random.uniform(kb, (hidden_size,), jnp.float32, -s, s)
        return w, b

    wq, bq = lin(ks[0], ks[1])
    wk, bk = lin(ks[2], ks[3])
    wv, bv = lin(ks[4], ks[5])
    wo, bo = lin(ks[6], ks[7])
    return dict(wq=wq, bq=bq, wk=wk, bk=bk, wv=wv, bv=bv, wo=wo, bo=bo)


def fuse_params(params, num_heads):
    """One-time weight fusion: concat QKV, fold 1/sqrt(Dh) into Wq/bq, cast bf16."""
    H = params["wq"].shape[0]
    Dh = H // num_heads
    scale = 1.0 / math.sqrt(Dh)
    w_qkv = jnp.concatenate(
        [params["wq"] * scale, params["wk"], params["wv"]], axis=1
    ).astype(jnp.bfloat16)
    b_qkv = jnp.concatenate(
        [params["bq"] * scale, params["bk"], params["bv"]], axis=0
    ).astype(jnp.float32)
    return dict(w_qkv=w_qkv, b_qkv=b_qkv,
                w_o=params["wo"].astype(jnp.bfloat16),
                b_o=params["bo"].astype(jnp.float32))


def expert_attention_unique(fused_params, hidden_states, attention_mask,
                            *, num_heads):
    """Forward pass of ExpertAttentionUnique (standard Attention branch, eval)."""
    B, S, H = hidden_states.shape

    x2d = hidden_states.reshape(B * S, H).astype(jnp.bfloat16)

    # Fused QKV projection: one pallas_call, x streamed from HBM once.
    qkv = linear(x2d, fused_params["w_qkv"], fused_params["b_qkv"])  # [B*S, 3H] bf16
    qkv = qkv.reshape(B, S, 3 * H)                                   # free reshape

    mask3 = attention_mask.reshape(B, 1, S).astype(jnp.float32)      # additive

    ctx = flash_attention(qkv, mask3, hidden=H, num_heads=num_heads) # [B, S, H]

    out = linear(ctx.reshape(B * S, H), fused_params["w_o"],
                 fused_params["b_o"], out_dtype=jnp.float32)
    return out.reshape(B, S, H)


# Pure-JAX f32 reference for a sanity check.
def _reference(params, x, mask, *, num_heads):
    B, S, H = x.shape
    Dh = H // num_heads
    q = x.reshape(B * S, H) @ params["wq"] + params["bq"]
    k = x.reshape(B * S, H) @ params["wk"] + params["bk"]
    v = x.reshape(B * S, H) @ params["wv"] + params["bv"]

    def sh(t):
        return t.reshape(B, S, num_heads, Dh).transpose(0, 2, 1, 3)

    q, k, v = sh(q), sh(k), sh(v)
    scores = jnp.einsum("bhqd,bhkd->bhqk", q, k) / math.sqrt(Dh) + mask
    p = jax.nn.softmax(scores, axis=-1)
    ctx = jnp.einsum("bhqk,bhkd->bhqd", p, v)
    ctx = ctx.transpose(0, 2, 1, 3).reshape(B * S, H)
    return (ctx @ params["wo"] + params["bo"]).reshape(B, S, H)


if __name__ == "__main__":
    master = jax.random.PRNGKey(0)
    case_keys = jax.random.split(master, 2)

    def run_case(key, B, S, H, nH):
        k_par, k_x, k_m = jax.random.split(key, 3)
        params = init_params(k_par, H)
        fused = fuse_params(params, nH)
        hidden_states = jax.random.normal(k_x, (B, S, H), jnp.float32)
        # Additive attention mask [B,1,1,S]: 0 attended, -10000 masked (finite).
        keep = (jax.random.uniform(k_m, (B, 1, 1, S)) > 0.2).astype(jnp.float32)
        attention_mask = (1.0 - keep) * -10000.0

        out = expert_attention_unique(fused, hidden_states, attention_mask,
                                      num_heads=nH)
        out = jax.block_until_ready(out)
        ref = _reference(params, hidden_states, attention_mask, num_heads=nH)
        assert out.shape == (B, S, H)
        # Tolerance covers bf16 activations/weights + approx (EUP) reciprocal.
        assert jnp.allclose(out, ref, atol=5e-2, rtol=5e-2), (
            f"mismatch vs reference for case {(B, S, H, nH)}")

    # Small spec-consistent case (hidden=32): exercises the fallback q/k/v split.
    run_case(case_keys[0], B=2, S=8, H=32, nH=4)
    # Dh=64 case: exercises the copy-free fused-QKV fast path with 2-head,
    # 128-lane-dense attention blocks.
    run_case(case_keys[1], B=2, S=16, H=256, nH=4)

    print("KERNEL_OK")
</pallas_src>

<mosaic_0001>
module attributes {stable_mosaic.version = 11 : i64} {
  func.func @_linear_resident_kernel(%arg0: i32, %arg1: memref<16x32xbf16, #tpu.memory_space<vmem>>, %arg2: memref<32x96xbf16, #tpu.memory_space<vmem>>, %arg3: memref<1x96xf32, #tpu.memory_space<vmem>>, %arg4: memref<16x96xbf16, #tpu.memory_space<vmem>>) attributes {dimension_semantics = [#tpu.dimension_semantics<parallel>], iteration_bounds = array<i64: 1>, scalar_prefetch = 0 : i64, scratch_operands = 0 : i64, tpu.core_type = #tpu.core_type<tc>, window_params = [{transform_indices = @transform_0, window_bounds = array<i64: 16, 32>}, {pipeline_mode = #tpu.pipeline_mode<synchronous>, transform_indices = @transform_1, window_bounds = array<i64: 32, 96>}, {pipeline_mode = #tpu.pipeline_mode<synchronous>, transform_indices = @transform_2, window_bounds = array<i64: 1, 96>}, {transform_indices = @transform_3, window_bounds = array<i64: 16, 96>}]} {
    %c0 = arith.constant 0 : index
    %c0_0 = arith.constant 0 : index
    %0 = vector.load %arg1[%c0, %c0_0] : memref<16x32xbf16, #tpu.memory_space<vmem>>, vector<16x32xbf16>
    %c0_1 = arith.constant 0 : index
    %c0_2 = arith.constant 0 : index
    %1 = vector.load %arg2[%c0_1, %c0_2] : memref<32x96xbf16, #tpu.memory_space<vmem>>, vector<32x96xbf16>
    %cst = arith.constant dense<0.000000e+00> : vector<16x96xf32>
    %2 = tpu.matmul %0, %1, %cst {dimension_numbers = #tpu.dot_dimension_numbers<[1], [0], [0], [1], [0, 0, 1, 1], [], []>} : vector<16x32xbf16>, vector<32x96xbf16>, vector<16x96xf32> -> vector<16x96xf32>
    %c0_3 = arith.constant 0 : index
    %c0_4 = arith.constant 0 : index
    %3 = vector.load %arg3[%c0_3, %c0_4] : memref<1x96xf32, #tpu.memory_space<vmem>>, vector<1x96xf32>
    %4 = vector.broadcast %3 : vector<1x96xf32> to vector<16x96xf32>
    %5 = arith.addf %2, %4 : vector<16x96xf32>
    %6 = arith.truncf %5 : vector<16x96xf32> to vector<16x96xbf16>
    %c0_5 = arith.constant 0 : index
    %c0_6 = arith.constant 0 : index
    %7 = vector.load %arg4[%c0_5, %c0_6] : memref<16x96xbf16, #tpu.memory_space<vmem>>, vector<16x96xbf16>
    tpu.vector_store %arg4[%c0_5, %c0_6], %6 {strides = array<i32>} : memref<16x96xbf16, #tpu.memory_space<vmem>>, vector<16x96xbf16>,
    return
  }
  func.func @transform_0(%arg0: i32) -> (i32, i32) {
    %c0_i32 = arith.constant 0 : i32
    %c0_i32_0 = arith.constant 0 : i32
    return %arg0, %c0_i32 : i32, i32
  }
  func.func @transform_1(%arg0: i32) -> (i32, i32) {
    %c0_i32 = arith.constant 0 : i32
    %c0_i32_0 = arith.constant 0 : i32
    %c0_i32_1 = arith.constant 0 : i32
    return %c0_i32, %c0_i32_0 : i32, i32
  }
  func.func @transform_2(%arg0: i32) -> (i32, i32) {
    %c0_i32 = arith.constant 0 : i32
    %c0_i32_0 = arith.constant 0 : i32
    %c0_i32_1 = arith.constant 0 : i32
    return %c0_i32, %c0_i32_0 : i32, i32
  }
  func.func @transform_3(%arg0: i32) -> (i32, i32) {
    %c0_i32 = arith.constant 0 : i32
    %c0_i32_0 = arith.constant 0 : i32
    return %arg0, %c0_i32 : i32, i32
  }
}

</mosaic_0001>

<bundles_post_ra>
// kernel: tpu_custom_call.1
= control target key start
LH: loop header
LB: loop body
LE: loop exit
PB: predicated region body
PF: predicated region fallthrough
CT: control target
= control target key end

     0   :  { %8 = vsyncpa [#allocation3], 0  ;;  %s264_s0 = inlined_call_operand.hbm [shape: bf16[16,32], index: 0, kind: input, shape index: {}]   ;;  %s265_s1 = inlined_call_operand.hbm [shape: bf16[32,96], index: 1, kind: input, shape index: {}]   ;;  %s266_s2 = inlined_call_operand.vmem [shape: f32[1,96], index: 2, kind: input, shape index: {}]   ;;  %s267_s3 = inlined_call_operand.hbm [shape: bf16[16,96], index: 3, kind: output, shape index: {}]  }
   0x1   :  { %9 = vsyncpa [#allocation6], 0 }
   0x2   :  { %10 = vsyncpa [#allocation4], 0  ;;  %s15_s14 = sshll.u32 %s264_s0, 4  ;;  %s218_s15 = smov [#allocation2]   ;;  %s16_s14 = int_to_ptr.hbm [resolvable:$true] %s15_s14 }
   0x3   :  { %s17_s16 = sshll.u32 %s218_s15, 4  ;;  %s28_s19 = sshll.u32 %s265_s1, 4  ;;  %s18_s16 = int_to_ptr.vmem [resolvable:$true] %s17_s16  ;;  %s29_s19 = int_to_ptr.hbm [resolvable:$true] %s28_s19 }
   0x4   :  { %s219_s20 = smov 64   ;;  %s220_s21 = smov 4  }
   0x5   :  { %23 = dma.hbm_to_vmem [thread:$0]  %s16_s14, 128, %s18_s16, [#allocation3], %s219_s20, %s219_s20, %s220_s21  }
   0x6   :  { %s221_s22 = smov [#allocation5]  }
   0x7   :  { %s30_s23 = sshll.u32 %s221_s22, 4  ;;  %s31_s23 = int_to_ptr.vmem [resolvable:$true] %s30_s23 }
   0x8   :  { %36 = dma.hbm_to_vmem [thread:$0]  %s29_s19, 256, %s31_s23, [#allocation6], %s219_s20, %s219_s20, %s220_s21  }
   0x9   :  { %212 = dma.done.wait [#allocation3], 128  }
   0xa   :  { %213 = vsyncadd [#allocation3], 4294967168 }
   0xb   :  { %214 = dma.done.wait [#allocation6], 256  }
   0xc   :  { %215 = vsyncadd [#allocation6], 4294967040  ;;  %v133_v0 = vld [vmem:[#allocation5 + $0x8] sm:$0xff]  ;;  %v132_v1 = vld [vmem:[#allocation5] sm:$0xff]  ;;  %vm75_vm0 = vcmask 261120   ;;  %vm95_vm1 = vcmask 781312  }
   0xd   :  { %85 = vmatpush.bf16.msra.mxu0 %v133_v0  ;;  %v131_v2 = vld [vmem:[#allocation2] sm:$0xff]  ;;  %s222_s24 = smov [#allocation7]   ;;  %s104_s28 = sshll.u32 %s267_s3, 4  ;;  %s105_s28 = int_to_ptr.hbm [resolvable:$true] %s104_s28 }
   0xe   :  { %v139_v3 = vld [vmem:[%s266_s2] ss:$0 sm:$0xff]  ;;  %s102_s25 = sshll.u32 %s222_s24, 4  ;;  %s103_s25 = int_to_ptr.vmem [resolvable:$true] %s102_s25 }
  0x11   :  { %86 = vmatpush.bf16.msra.mxu0 %v132_v1 }
  0x14   :  { %130 = vmatmul.msk.bf16.vlgmr.msra.gmra.mxu0 %vm75_vm0, %v131_v2 }
  0x91   :  { %v88_v4 = vpop.f32.mrf.mxu0 }
  0x92   :  { %v89_v5 = vadd.f32 %v139_v3, %v88_v4 }
  0x94   :  { %v93_v6 = vpack.c.bf16 %v89_v5, %v89_v5 }
  0x96   :  { %96 = vst.msk [vmem:[#allocation7] sm:$0xf] %vm95_vm1, %v93_v6 }
  0x99   :  { %v90_v7 = vpop.f32.mrf.mxu0 }
  0x9a   :  { %v91_v8 = vadd.f32 %v139_v3, %v90_v7 }
  0x9c   :  { %v94_v9 = vpack.c.bf16 %v91_v8, %v91_v8 }
  0x9e   :  { %97 = vst.msk [vmem:[#allocation7 + $0x4] sm:$0xf] %vm95_vm1, %v94_v9 }
  0x9f   :  { %110 = dma.vmem_to_hbm [thread:$0]  %s103_s25, 128, %s105_s28, [#allocation4], %s219_s20, %s219_s20, %s220_s21  }
  0xa0   :  { %216 = dma.done.wait [#allocation4], 128  }
  0xa1   :  { %217 = vsyncadd [#allocation4], 4294967168 }
  0xa2   :  { %115 = vsyncpa [#allocation3], 1 }
  0xa3   :  { %116 = vsyncpa [#allocation6], 1 }
  0xa4   :  { %117 = vsyncpa [#allocation4], 1 }

</bundles_post_ra>
